<compile_context>
chip_gen: v6e
topology: v6e:2x2x1
jax: 0.10.0
libtpu: 0.0.40
codegen_flags: <defaults>
</compile_context>

<pallas_src>
import jax
import jax.numpy as jnp
from jax.experimental import pallas as pl
from jax.experimental.pallas import tpu as pltpu


# ----------------------------------------------------------------------------
# Kernel
# ----------------------------------------------------------------------------
def diag_normal_kernel(x_ref, w0_ref, b0_ref, wcat_ref, bcat_ref, out_ref):
    # base_net: h = relu(x @ W0 + b0)   (f32 accumulation, f32 elementwise)
    x = x_ref[...].astype(w0_ref.dtype)
    h = jnp.dot(x, w0_ref[...], preferred_element_type=jnp.float32)
    h = jnp.maximum(h + b0_ref[...].astype(jnp.float32), 0.0)

    # Fused heads: [mu | log_var] = h @ [Wmu | Wvar] + [bmu | bvar]
    out = jnp.dot(h.astype(wcat_ref.dtype), wcat_ref[...],
                  preferred_element_type=jnp.float32)
    out = out + bcat_ref[...].astype(jnp.float32)
    out_ref[...] = out.astype(out_ref.dtype)


# ----------------------------------------------------------------------------
# Generation-aware configuration
# ----------------------------------------------------------------------------
def _round_up(x, m):
    return ((x + m - 1) // m) * m


def _tpu_config():
    """Best-effort chip-generation detection -> VMEM budget / alignment."""
    try:
        kind = jax.devices()[0].device_kind.lower()
    except Exception:  # pragma: no cover
        kind = ""
    if "v7" in kind:
        # 64 MiB physical VMEM, 2 TensorCores per chip, 256x256 MXU.
        return dict(gen=7, num_tc=2, align=256,
                    vmem_budget=40 << 20, vmem_limit=56 << 20)
    if "v5" in kind:
        # 128 MiB physical but 16 MiB scoped default; 128x128 MXU.
        return dict(gen=5, num_tc=1, align=128,
                    vmem_budget=48 << 20, vmem_limit=64 << 20)
    # Default: v6e-like (128 MiB VMEM, 256x256 MXU, 1 TC).
    return dict(gen=6, num_tc=1, align=256,
                vmem_budget=64 << 20, vmem_limit=96 << 20)


def _compute_batch_tile(B, D_in, H, out_store, x_bytes, w_bytes, out_bytes,
                        cfg, max_batch_tile):
    """Largest MXU-aligned batch tile that fits the generation's VMEM budget."""
    align = cfg["align"]
    # Weights/biases are single-buffered (pl.Buffered(1)) and fully resident.
    resident = (D_in * H + H * out_store) * w_bytes + (H + out_store) * 4

    def fits(tb):
        act = 2 * tb * (D_in * x_bytes + out_store * out_bytes)  # dbl-buffered
        interm = tb * H * 4                                      # f32 h tile
        return resident + act + interm <= cfg["vmem_budget"]

    tb_cap = min(max_batch_tile, B)
    if cfg["num_tc"] >= 2 and B > align:
        # Make the "parallel" batch axis produce >= num_tc tiles (v7x: 2 TCs).
        tb_cap = min(tb_cap, _round_up(pl.cdiv(B, cfg["num_tc"]), align))

    if tb_cap >= B:
        if B <= align or fits(B):
            return B                     # single full-dim tile
        tb_cap = B
    tb = max(align, (tb_cap // align) * align)
    while tb > align and not fits(tb):
        tb -= align
    return tb


# ----------------------------------------------------------------------------
# One-time parameter preparation (NOT per-forward)
# ----------------------------------------------------------------------------
def prepare_diag_normal_params(w0, b0, wmu, bmu, wvar, bvar, *,
                               mxu_dtype=None,
                               lane_pad_max_amplification=2.0):
    """Fuse fc_mu/fc_var into one [H, 2*O] head and (optionally) lane-pad it.

    Call once at parameter setup / load time.  `mxu_dtype=jnp.bfloat16` casts
    the matmul weights for the MXU (f32 accumulation is kept in-kernel).
    """
    D_in, H = w0.shape
    O = wmu.shape[1]
    out_dim = 2 * O

    wcat = jnp.concatenate([wmu, wvar], axis=-1)                   # (H, 2*O)
    bcat = jnp.concatenate([bmu.reshape(1, -1), bvar.reshape(1, -1)], axis=-1)

    # Lane-dense padding only when it does not blow up output HBM traffic.
    padded = _round_up(out_dim, 128)
    if padded != out_dim and padded / out_dim <= lane_pad_max_amplification:
        out_store = padded
        wcat = jnp.pad(wcat, ((0, 0), (0, out_store - out_dim)))
        bcat = jnp.pad(bcat, ((0, 0), (0, out_store - out_dim)))
    else:
        out_store = out_dim

    if mxu_dtype is not None:
        w0 = w0.astype(mxu_dtype)
        wcat = wcat.astype(mxu_dtype)

    return dict(w0=w0, b0=b0.reshape(1, H).astype(jnp.float32),
                wcat=wcat, bcat=bcat.reshape(1, out_store).astype(jnp.float32),
                D_in=D_in, H=H, out_dim=out_dim, out_store=out_store)


# ----------------------------------------------------------------------------
# Forward
# ----------------------------------------------------------------------------
def diag_normal_net(x, params, *, max_batch_tile=512, out_dtype=jnp.float32):
    """Fused DiagNormalNet forward: concat([mu, log_var], -1) of shape (B, 2*O)."""
    B, D_in = x.shape
    assert D_in == params["D_in"]
    H = params["H"]
    out_dim = params["out_dim"]
    out_store = params["out_store"]

    w0, b0 = params["w0"], params["b0"]
    wcat, bcat = params["wcat"], params["bcat"]

    if x.dtype != w0.dtype:
        x = x.astype(w0.dtype)          # bf16 path: halves x DMA bytes

    cfg = _tpu_config()
    TB = _compute_batch_tile(
        B, D_in, H, out_store,
        x_bytes=x.dtype.itemsize, w_bytes=w0.dtype.itemsize,
        out_bytes=jnp.dtype(out_dtype).itemsize,
        cfg=cfg, max_batch_tile=max_batch_tile)
    grid = (pl.cdiv(B, TB),)

    single_buf = pl.Buffered(buffer_count=1)   # constant-index -> no double buf

    out_padded = pl.pallas_call(
        diag_normal_kernel,
        out_shape=jax.ShapeDtypeStruct((B, out_store), out_dtype),
        grid_spec=pltpu.PrefetchScalarGridSpec(
            num_scalar_prefetch=0,
            grid=grid,
            in_specs=[
                # activations: tiled over batch, double-buffered (default)
                pl.BlockSpec((TB, D_in), lambda i: (i, 0)),
                # resident weights / biases: single-buffered
                pl.BlockSpec((D_in, H), lambda i: (0, 0),
                             pipeline_mode=single_buf),
                pl.BlockSpec((1, H), lambda i: (0, 0),
                             pipeline_mode=single_buf),
                pl.BlockSpec((H, out_store), lambda i: (0, 0),
                             pipeline_mode=single_buf),
                pl.BlockSpec((1, out_store), lambda i: (0, 0),
                             pipeline_mode=single_buf),
            ],
            out_specs=pl.BlockSpec((TB, out_store), lambda i: (i, 0)),
        ),
        compiler_params=pltpu.CompilerParams(
            dimension_semantics=("parallel",),
            vmem_limit_bytes=cfg["vmem_limit"],
        ),
    )(x, w0, b0, wcat, bcat)

    if out_store != out_dim:
        return out_padded[:, :out_dim]   # cheap XLA slice (fuses under jit)
    return out_padded


# ----------------------------------------------------------------------------
# Self-test
# ----------------------------------------------------------------------------
if __name__ == "__main__":
    # Small shapes consistent with the module:
    #   batch=8, input_dim=16, last_hidden_dim=32, output_dim=8
    B, D_IN, H, O = 8, 16, 32, 8

    key = jax.random.PRNGKey(0)
    k_x, k_w0, k_b0, k_wm, k_bm, k_wv, k_bv = jax.random.split(key, 7)

    x = jax.random.normal(k_x, (B, D_IN), dtype=jnp.float32)

    # base_net (Linear(D_IN, H) + ReLU) parameters
    w0 = jax.random.normal(k_w0, (D_IN, H), dtype=jnp.float32) * 0.1
    b0 = jax.random.normal(k_b0, (1, H), dtype=jnp.float32) * 0.1
    # fc_mu: Linear(H, O)
    wmu = jax.random.normal(k_wm, (H, O), dtype=jnp.float32) * 0.1
    bmu = jax.random.normal(k_bm, (1, O), dtype=jnp.float32) * 0.1
    # fc_var: Linear(H, O)
    wvar = jax.random.normal(k_wv, (H, O), dtype=jnp.float32) * 0.1
    bvar = jax.random.normal(k_bv, (1, O), dtype=jnp.float32) * 0.1

    # One-time parameter prep (f32 MXU path to keep the 1e-5 check exact;
    # pass mxu_dtype=jnp.bfloat16 for MXU-bound shapes on v6e/v7x).
    params = prepare_diag_normal_params(w0, b0, wmu, bmu, wvar, bvar)

    out = diag_normal_net(x, params)
    out = jax.block_until_ready(out)

    # Reference check in plain JAX (matches the torch module's forward).
    h_ref = jnp.maximum(x @ w0 + b0, 0.0)
    ref = jnp.concatenate([h_ref @ wmu + bmu, h_ref @ wvar + bvar], axis=-1)
    assert out.shape == (B, 2 * O)
    assert jnp.allclose(out, ref, atol=1e-5, rtol=1e-5)

    print("KERNEL_OK")
</pallas_src>

<mosaic_0001>
module attributes {stable_mosaic.version = 11 : i64} {
  func.func @diag_normal_kernel(%arg0: i32, %arg1: memref<8x16xf32, #tpu.memory_space<vmem>>, %arg2: memref<16x32xf32, #tpu.memory_space<vmem>>, %arg3: memref<1x32xf32, #tpu.memory_space<vmem>>, %arg4: memref<32x16xf32, #tpu.memory_space<vmem>>, %arg5: memref<1x16xf32, #tpu.memory_space<vmem>>, %arg6: memref<8x16xf32, #tpu.memory_space<vmem>>) attributes {dimension_semantics = [#tpu.dimension_semantics<parallel>], iteration_bounds = array<i64: 1>, scalar_prefetch = 0 : i64, scratch_operands = 0 : i64, tpu.core_type = #tpu.core_type<tc>, window_params = [{transform_indices = @transform_0, window_bounds = array<i64: 8, 16>}, {pipeline_mode = #tpu.pipeline_mode<synchronous>, transform_indices = @transform_1, window_bounds = array<i64: 16, 32>}, {pipeline_mode = #tpu.pipeline_mode<synchronous>, transform_indices = @transform_2, window_bounds = array<i64: 1, 32>}, {pipeline_mode = #tpu.pipeline_mode<synchronous>, transform_indices = @transform_3, window_bounds = array<i64: 32, 16>}, {pipeline_mode = #tpu.pipeline_mode<synchronous>, transform_indices = @transform_4, window_bounds = array<i64: 1, 16>}, {transform_indices = @transform_5, window_bounds = array<i64: 8, 16>}]} {
    %c0 = arith.constant 0 : index
    %c0_0 = arith.constant 0 : index
    %0 = vector.load %arg1[%c0, %c0_0] : memref<8x16xf32, #tpu.memory_space<vmem>>, vector<8x16xf32>
    %c0_1 = arith.constant 0 : index
    %c0_2 = arith.constant 0 : index
    %1 = vector.load %arg2[%c0_1, %c0_2] : memref<16x32xf32, #tpu.memory_space<vmem>>, vector<16x32xf32>
    %cst = arith.constant dense<0.000000e+00> : vector<8x32xf32>
    %2 = tpu.matmul %0, %1, %cst {dimension_numbers = #tpu.dot_dimension_numbers<[1], [0], [0], [1], [0, 0, 1, 1], [], []>} : vector<8x16xf32>, vector<16x32xf32>, vector<8x32xf32> -> vector<8x32xf32>
    %c0_3 = arith.constant 0 : index
    %c0_4 = arith.constant 0 : index
    %3 = vector.load %arg3[%c0_3, %c0_4] : memref<1x32xf32, #tpu.memory_space<vmem>>, vector<1x32xf32>
    %4 = vector.broadcast %3 : vector<1x32xf32> to vector<8x32xf32>
    %5 = arith.addf %2, %4 : vector<8x32xf32>
    %cst_5 = arith.constant 0.000000e+00 : f32
    %6 = vector.broadcast %cst_5 : f32 to vector<8x32xf32>
    %7 = arith.maximumf %5, %6 : vector<8x32xf32>
    %c0_6 = arith.constant 0 : index
    %c0_7 = arith.constant 0 : index
    %8 = vector.load %arg4[%c0_6, %c0_7] : memref<32x16xf32, #tpu.memory_space<vmem>>, vector<32x16xf32>
    %cst_8 = arith.constant dense<0.000000e+00> : vector<8x16xf32>
    %9 = tpu.matmul %7, %8, %cst_8 {dimension_numbers = #tpu.dot_dimension_numbers<[1], [0], [0], [1], [0, 0, 1, 1], [], []>} : vector<8x32xf32>, vector<32x16xf32>, vector<8x16xf32> -> vector<8x16xf32>
    %c0_9 = arith.constant 0 : index
    %c0_10 = arith.constant 0 : index
    %10 = vector.load %arg5[%c0_9, %c0_10] : memref<1x16xf32, #tpu.memory_space<vmem>>, vector<1x16xf32>
    %11 = vector.broadcast %10 : vector<1x16xf32> to vector<8x16xf32>
    %12 = arith.addf %9, %11 : vector<8x16xf32>
    %c0_11 = arith.constant 0 : index
    %c0_12 = arith.constant 0 : index
    %13 = vector.load %arg6[%c0_11, %c0_12] : memref<8x16xf32, #tpu.memory_space<vmem>>, vector<8x16xf32>
    tpu.vector_store %arg6[%c0_11, %c0_12], %12 {strides = array<i32>} : memref<8x16xf32, #tpu.memory_space<vmem>>, vector<8x16xf32>,
    return
  }
  func.func @transform_0(%arg0: i32) -> (i32, i32) {
    %c0_i32 = arith.constant 0 : i32
    %c0_i32_0 = arith.constant 0 : i32
    return %arg0, %c0_i32 : i32, i32
  }
  func.func @transform_1(%arg0: i32) -> (i32, i32) {
    %c0_i32 = arith.constant 0 : i32
    %c0_i32_0 = arith.constant 0 : i32
    %c0_i32_1 = arith.constant 0 : i32
    return %c0_i32, %c0_i32_0 : i32, i32
  }
  func.func @transform_2(%arg0: i32) -> (i32, i32) {
    %c0_i32 = arith.constant 0 : i32
    %c0_i32_0 = arith.constant 0 : i32
    %c0_i32_1 = arith.constant 0 : i32
    return %c0_i32, %c0_i32_0 : i32, i32
  }
  func.func @transform_3(%arg0: i32) -> (i32, i32) {
    %c0_i32 = arith.constant 0 : i32
    %c0_i32_0 = arith.constant 0 : i32
    %c0_i32_1 = arith.constant 0 : i32
    return %c0_i32, %c0_i32_0 : i32, i32
  }
  func.func @transform_4(%arg0: i32) -> (i32, i32) {
    %c0_i32 = arith.constant 0 : i32
    %c0_i32_0 = arith.constant 0 : i32
    %c0_i32_1 = arith.constant 0 : i32
    return %c0_i32, %c0_i32_0 : i32, i32
  }
  func.func @transform_5(%arg0: i32) -> (i32, i32) {
    %c0_i32 = arith.constant 0 : i32
    %c0_i32_0 = arith.constant 0 : i32
    return %arg0, %c0_i32 : i32, i32
  }
}

</mosaic_0001>

<bundles_post_ra>
// kernel: tpu_custom_call.1
= control target key start
LH: loop header
LB: loop body
LE: loop exit
PB: predicated region body
PF: predicated region fallthrough
CT: control target
= control target key end

     0   :  { %v261_v1 = vmov 0.0   ;;  %vm262_vm0 = vmmov 0   ;;  %s326_s0 = inlined_call_operand.vmem [shape: f32[8,16], index: 0, kind: input, shape index: {}]   ;;  %s327_s1 = inlined_call_operand.vmem [shape: f32[16,32], index: 1, kind: input, shape index: {}]   ;;  %s328_s2 = inlined_call_operand.vmem [shape: f32[1,32], index: 2, kind: input, shape index: {}]   ;;  %s329_s3 = inlined_call_operand.vmem [shape: f32[32,16], index: 3, kind: input, shape index: {}]   ;;  %s330_s4 = inlined_call_operand.vmem [shape: f32[1,16], index: 4, kind: input, shape index: {}]   ;;  %s331_s5 = inlined_call_operand.hbm [shape: f32[8,16], index: 5, kind: output, shape index: {}]  }
   0x1   :  { %v23_v0 = vld [vmem:[%s327_s1 + $0x8] sm:$0xff]  ;;  %218 = vmatprep.subr.mxu0 %v261_v1  ;;  %v22_v2 = vld [vmem:[%s327_s1] sm:$0xff]  ;;  %222 = vmatprep.mubr.msk.f32.mxu0 %vm262_vm0, %v261_v1  ;;  %v109_v3 = vld [vmem:[%s329_s3 + $0x18] sm:$0xff] }
   0x2   :  { %10 = vsyncpa [#allocation3], 0  ;;  %219 = vmatpush3.msra.mxu0 %v23_v0  ;;  %v21_v4 = vld [vmem:[%s326_s0] sm:$0xff]  ;;  %vm31_vm1 = vcmask 130048   ;;  %225 = vmatprep.subr.mxu1 %v261_v1  ;;  %v108_v5 = vld [vmem:[%s329_s3 + $0x10] sm:$0xff]  ;;  %vm117_vm2 = vcmask 261120  }
   0x3   :  { %220 = vmatprep.subr.mxu0 %v261_v1  ;;  %226 = vmatpush3.msra.mxu1 %v109_v3  ;;  %v107_v6 = vld [vmem:[%s329_s3 + $0x8] sm:$0xff]  ;;  %v106_v7 = vld [vmem:[%s329_s3] sm:$0xff]  ;;  %s263_s9 = smov [#allocation2]  }
   0x4   :  { %221 = vmatpush3.msra.mxu0 %v22_v2  ;;  %227 = vmatprep.subr.mxu1 %v261_v1  ;;  %v206_v8 = vld [vmem:[%s328_s2] ss:$0 sm:$0xff]  ;;  %s198_s10 = sshll.u32 %s263_s9, 4  ;;  %s199_s10 = int_to_ptr.vmem [resolvable:$true] %s198_s10 }
   0x5   :  { %223 = vmatmul.mubr.msk.f32.vlgmr.msra.gmra.mxu0 %vm31_vm1, %v21_v4  ;;  %233 = vmatprep.mubr.msk.f32.mxu1 %vm262_vm0, %v261_v1  ;;  %v208_v13 = vld [vmem:[%s330_s4] ss:$0 sm:$0xff]  ;;  %s239_s3 = scalar_lea.vmem %s199_s10, 128  ;;  %p244_p1 = scmp.lt.s32.totalorder %s199_s10, %s199_s10 }
   0x6   :  { %228 = vmatpush3.msra.mxu1 %v108_v5  ;;  %p240_p0 = scmp.ne.s32.totalorder %s199_s10, %s239_s3  ;;  %p245_p2 = scmp.lt.s32.totalorder %s239_s3, %s239_s3 }
   0x7   :  { %229 = vmatprep.subr.mxu1 %v261_v1 }
   0x8   :  { %230 = vmatpush3.msra.mxu1 %v107_v6  ;;  %p246_p3 = por %p245_p2, %p244_p1 }
   0x9   :  { %231 = vmatprep.subr.mxu1 %v261_v1 }
   0xa   :  { %232 = vmatpush3.msra.mxu1 %v106_v7  ;;  %p247_p4 = pnand %p246_p3, %p240_p0 }
  0xc5   :  { %v101_v9 = vpop.f32.mrf.mxu0 }
  0xc6   :  { %v102_v10 = vadd.f32 %v206_v8, %v101_v9 }
  0xc7   :  { %v224_v11 = vpop.f32.mrf.mxu0 }
  0xc8   :  { %v105_v12 = vmax.f32 %v102_v10, 0.0 }
  0xca   :  { %234 = vmatmul.mubr.msk.f32.vlgmr.msra.gmra.mxu1 %vm117_vm2, %v105_v12 }
 0x18a   :  { %v187_v14 = vpop.f32.mrf.mxu1 }
 0x18b   :  { %v188_v15 = vadd.f32 %v208_v13, %v187_v14 }
 0x18c   :  { %v235_v16 = vpop.f32.mrf.mxu1 }
 0x18d   :  { %191 = vst.msk [vmem:[#allocation2] sm:$0xff] %vm31_vm1, %v188_v15 }
 0x18e   :  { %250 = shalt.err (!%p247_p4)
}
 0x18f   :  { %201 = dma.vmem_to_hbm [thread:$0]  %s199_s10, 128, %s331_s5, [#allocation3]  }
 0x190   :  { %259 = dma.done.wait [#allocation3], 128  }
 0x191   :  { %260 = vsyncadd [#allocation3], 4294967168 }
 0x192   :  { %205 = vsyncpa [#allocation3], 1 }

</bundles_post_ra>
